<compile_context>
chip_gen: v7x
topology: tpu7x:2x2x1
jax: 0.10.0
libtpu: 0.0.40
codegen_flags: <defaults>
</compile_context>

<pallas_src>
import functools

import jax
import jax.numpy as jnp
import numpy as np
from jax import lax
from jax.experimental import pallas as pl
from jax.experimental.pallas import tpu as pltpu


# ----------------------------------------------------------------------------
# Pallas kernel: fused-embed gi (one batched matmul) -> unrolled GRU recurrence
#                -> fc (one batched matmul) -> single consolidated store.
# ----------------------------------------------------------------------------
def gru_model_kernel(x_ref,        # (S*B, 4)   time-major flattened input
                     wx_ref,       # (4, 3H)    fused embed+input-hidden weights [r|z|n]
                     bx_ref,       # (1, 3H)    fused bias (be @ wih + bih)
                     whh_ref,      # (H, 3H)    fused hidden-hidden weights [r|z|n]
                     bhh_ref,      # (1, 3H)
                     wfc_ref,      # (H, C)     fc weight (in, out)
                     bfc_ref,      # (1, C)     fc bias
                     out_ref,      # (S*B, C)   time-major flattened output
                     hs_ref):      # scratch: VMEM (S, B, H) f32 hidden states
    S, B, H = hs_ref.shape

    # ---- hoisted, time-independent batched matmul (embed already folded) ----
    gi = jnp.dot(x_ref[...], wx_ref[...],
                 preferred_element_type=jnp.float32) + bx_ref[...]        # (S*B, 3H)
    gi = gi.reshape(S, B, 3 * H)    # time-major: gi[t] is a leading-axis index

    whh = whh_ref[...]                                                    # (H, 3H)
    bhh = jnp.broadcast_to(bhh_ref[...], (B, 3 * H))                      # hoisted broadcast

    # ---- serial recurrence: one small matmul + gate math per timestep -------
    h = jnp.zeros((B, H), jnp.float32)
    for t in range(S):  # static, fully unrolled (S is small and fixed)
        gi_t = gi[t]                                                      # (B, 3H)
        gh = jnp.dot(h, whh, preferred_element_type=jnp.float32) + bhh    # (B, 3H)

        r = jax.nn.sigmoid(gi_t[:, 0:H] + gh[:, 0:H])
        z = jax.nn.sigmoid(gi_t[:, H:2 * H] + gh[:, H:2 * H])
        n = jnp.tanh(gi_t[:, 2 * H:3 * H] + r * gh[:, 2 * H:3 * H])
        h = (1.0 - z) * n + z * h
        hs_ref[t] = h            # leading-axis store into (S, B, H) scratch

    # ---- hoisted fc + single consolidated output store ----------------------
    hs2d = hs_ref[...].reshape(S * B, H)                                  # (S*B, H)
    out_ref[...] = (jnp.dot(hs2d, wfc_ref[...],
                            preferred_element_type=jnp.float32) + bfc_ref[...])


# ----------------------------------------------------------------------------
# Wrapper: fold embed into GRU input weights, present time-major flattened
# layout to the kernel, undo the layout plumbing on the way out.
# ----------------------------------------------------------------------------
@functools.partial(jax.jit, static_argnames=())
def gru_model_forward(x, params):
    """x: (B, S, 4) float32 -> (B, S, num_classes) float32."""
    B, S, _ = x.shape
    H = params["whh"].shape[0]
    C = params["wfc"].shape[1]

    # Exact composition of two affine maps (embed o input-hidden); computed at
    # HIGHEST precision so the fold itself introduces no matmul-pass error.
    hi = lax.Precision.HIGHEST
    wx = jnp.dot(params["we"], params["wih"], precision=hi)               # (4, 3H)
    bx = jnp.dot(params["be"], params["wih"], precision=hi) + params["bih"]  # (1, 3H)

    # Time-major, flattened input so per-step kernel accesses are leading-axis
    # tile indices (wrapper-side layout plumbing, negligible at this size).
    x_tm = jnp.transpose(x, (1, 0, 2)).reshape(S * B, 4)

    vmem = pl.BlockSpec(memory_space=pltpu.MemorySpace.VMEM)
    out_tm = pl.pallas_call(
        gru_model_kernel,
        out_shape=jax.ShapeDtypeStruct((S * B, C), jnp.float32),
        in_specs=[vmem] * 7,
        out_specs=vmem,
        scratch_shapes=[pltpu.VMEM((S, B, H), jnp.float32)],
    )(x_tm, wx, bx,
      params["whh"], params["bhh"],
      params["wfc"], params["bfc"])

    # Undo time-major layout: (S*B, C) -> (B, S, C).
    return jnp.transpose(out_tm.reshape(S, B, C), (1, 0, 2))


# ----------------------------------------------------------------------------
# Pure-JAX reference (PyTorch GRU semantics, UN-fused embed/GRU parameters so
# the algebraic fold in the wrapper is validated against the original math).
# ----------------------------------------------------------------------------
def reference_forward(x, params):
    B, S, _ = x.shape
    H = params["whh"].shape[0]

    y = x @ params["we"] + params["be"]                      # (B, S, E)
    gi = y @ params["wih"] + params["bih"]                   # (B, S, 3H)
    h0 = jnp.zeros((B, H), jnp.float32)

    def cell(h, gi_t):
        gh = h @ params["whh"] + params["bhh"]               # (B, 3H)
        r = jax.nn.sigmoid(gi_t[:, :H] + gh[:, :H])
        z = jax.nn.sigmoid(gi_t[:, H:2 * H] + gh[:, H:2 * H])
        n = jnp.tanh(gi_t[:, 2 * H:] + r * gh[:, 2 * H:])
        h_new = (1.0 - z) * n + z * h
        return h_new, h_new

    _, hs = lax.scan(cell, h0, jnp.transpose(gi, (1, 0, 2)))  # (S, B, H)
    hs = jnp.transpose(hs, (1, 0, 2))                         # (B, S, H)
    return hs @ params["wfc"] + params["bfc"]


# ----------------------------------------------------------------------------
# Deterministic parameter construction (shapes from the module __init__),
# GRU gate weights stored fused along the output dim: [r | z | n].
# ----------------------------------------------------------------------------
def make_params(key, embed_size, hidden_size, num_classes):
    ks = jax.random.split(key, 8)
    scale = 0.1
    return {
        # embed: Linear(4, E)  (stored as (in, out))
        "we": scale * jax.random.normal(ks[0], (4, embed_size), jnp.float32),
        "be": scale * jax.random.normal(ks[1], (1, embed_size), jnp.float32),
        # GRU: fused weight_ih (E, 3H) / weight_hh (H, 3H), gate order [r, z, n]
        "wih": scale * jax.random.normal(ks[2], (embed_size, 3 * hidden_size), jnp.float32),
        "bih": scale * jax.random.normal(ks[3], (1, 3 * hidden_size), jnp.float32),
        "whh": scale * jax.random.normal(ks[4], (hidden_size, 3 * hidden_size), jnp.float32),
        "bhh": scale * jax.random.normal(ks[5], (1, 3 * hidden_size), jnp.float32),
        # fc: Linear(H, C)  (stored as (in, out))
        "wfc": scale * jax.random.normal(ks[6], (hidden_size, num_classes), jnp.float32),
        "bfc": scale * jax.random.normal(ks[7], (1, num_classes), jnp.float32),
    }


if __name__ == "__main__":
    B, S = 2, 8
    EMBED, HIDDEN, NUM_CLASSES = 64, 64, 8   # module defaults: embed=hidden=64

    key = jax.random.PRNGKey(0)
    kx, kp = jax.random.split(key)
    x = jax.random.normal(kx, (B, S, 4), jnp.float32)
    params = make_params(kp, EMBED, HIDDEN, NUM_CLASSES)

    out = gru_model_forward(x, params)
    out = jax.block_until_ready(out)

    ref = reference_forward(x, params)
    # Tolerance loosened vs. 1e-5: the embed/GRU weight fold reassociates two
    # f32 matmuls, and default-precision f32 dots may run as bf16 MXU passes,
    # so kernel and reference are no longer bit-structurally identical.
    np.testing.assert_allclose(np.asarray(out), np.asarray(ref), rtol=2e-3, atol=2e-3)
    assert out.shape == (B, S, NUM_CLASSES)

    print("KERNEL_OK")
</pallas_src>

<mosaic_0001>
module attributes {stable_mosaic.version = 11 : i64} {
  func.func @gru_model_kernel(%arg0: memref<16x4xf32, #tpu.memory_space<vmem>>, %arg1: memref<4x192xf32, #tpu.memory_space<vmem>>, %arg2: memref<1x192xf32, #tpu.memory_space<vmem>>, %arg3: memref<64x192xf32, #tpu.memory_space<vmem>>, %arg4: memref<1x192xf32, #tpu.memory_space<vmem>>, %arg5: memref<64x8xf32, #tpu.memory_space<vmem>>, %arg6: memref<1x8xf32, #tpu.memory_space<vmem>>, %arg7: memref<16x8xf32, #tpu.memory_space<vmem>>, %arg8: memref<8x2x64xf32, #tpu.memory_space<vmem>>) attributes {dimension_semantics = [], scalar_prefetch = 0 : i64, scratch_operands = 1 : i64, tpu.core_type = #tpu.core_type<tc>} {
    %c0 = arith.constant 0 : index
    %c0_0 = arith.constant 0 : index
    %0 = vector.load %arg0[%c0, %c0_0] : memref<16x4xf32, #tpu.memory_space<vmem>>, vector<16x4xf32>
    %c0_1 = arith.constant 0 : index
    %c0_2 = arith.constant 0 : index
    %1 = vector.load %arg1[%c0_1, %c0_2] : memref<4x192xf32, #tpu.memory_space<vmem>>, vector<4x192xf32>
    %cst = arith.constant dense<0.000000e+00> : vector<16x192xf32>
    %2 = tpu.matmul %0, %1, %cst {dimension_numbers = #tpu.dot_dimension_numbers<[1], [0], [0], [1], [0, 0, 1, 1], [], []>} : vector<16x4xf32>, vector<4x192xf32>, vector<16x192xf32> -> vector<16x192xf32>
    %c0_3 = arith.constant 0 : index
    %c0_4 = arith.constant 0 : index
    %3 = vector.load %arg2[%c0_3, %c0_4] : memref<1x192xf32, #tpu.memory_space<vmem>>, vector<1x192xf32>
    %4 = vector.broadcast %3 : vector<1x192xf32> to vector<16x192xf32>
    %5 = arith.addf %2, %4 : vector<16x192xf32>
    %6 = vector.shape_cast %5 : vector<16x192xf32> to vector<8x2x192xf32>
    %c0_5 = arith.constant 0 : index
    %c0_6 = arith.constant 0 : index
    %7 = vector.load %arg3[%c0_5, %c0_6] : memref<64x192xf32, #tpu.memory_space<vmem>>, vector<64x192xf32>
    %c0_7 = arith.constant 0 : index
    %c0_8 = arith.constant 0 : index
    %8 = vector.load %arg4[%c0_7, %c0_8] : memref<1x192xf32, #tpu.memory_space<vmem>>, vector<1x192xf32>
    %9 = vector.shape_cast %8 : vector<1x192xf32> to vector<1x192xf32>
    %10 = vector.broadcast %9 : vector<1x192xf32> to vector<2x192xf32>
    %cst_9 = arith.constant 0.000000e+00 : f32
    %11 = vector.broadcast %cst_9 : f32 to vector<2x64xf32>
    %12 = vector.extract_strided_slice %6 {offsets = [0, 0, 0], sizes = [1, 2, 192], strides = [1, 1, 1]} : vector<8x2x192xf32> to vector<1x2x192xf32>
    %13 = vector.shape_cast %12 : vector<1x2x192xf32> to vector<2x192xf32>
    %cst_10 = arith.constant dense<0.000000e+00> : vector<2x192xf32>
    %14 = tpu.matmul %11, %7, %cst_10 {dimension_numbers = #tpu.dot_dimension_numbers<[1], [0], [0], [1], [0, 0, 1, 1], [], []>} : vector<2x64xf32>, vector<64x192xf32>, vector<2x192xf32> -> vector<2x192xf32>
    %15 = arith.addf %14, %10 : vector<2x192xf32>
    %16 = vector.extract_strided_slice %13 {offsets = [0, 0], sizes = [2, 64], strides = [1, 1]} : vector<2x192xf32> to vector<2x64xf32>
    %17 = vector.extract_strided_slice %15 {offsets = [0, 0], sizes = [2, 64], strides = [1, 1]} : vector<2x192xf32> to vector<2x64xf32>
    %18 = arith.addf %16, %17 : vector<2x64xf32>
    %19 = arith.negf %18 : vector<2x64xf32>
    %20 = math.exp %19 : vector<2x64xf32>
    %cst_11 = arith.constant 1.000000e+00 : f32
    %21 = vector.broadcast %cst_11 : f32 to vector<2x64xf32>
    %22 = arith.addf %21, %20 : vector<2x64xf32>
    %23 = arith.divf %21, %22 : vector<2x64xf32>
    %24 = vector.extract_strided_slice %13 {offsets = [0, 64], sizes = [2, 64], strides = [1, 1]} : vector<2x192xf32> to vector<2x64xf32>
    %25 = vector.extract_strided_slice %15 {offsets = [0, 64], sizes = [2, 64], strides = [1, 1]} : vector<2x192xf32> to vector<2x64xf32>
    %26 = arith.addf %24, %25 : vector<2x64xf32>
    %27 = arith.negf %26 : vector<2x64xf32>
    %28 = math.exp %27 : vector<2x64xf32>
    %cst_12 = arith.constant 1.000000e+00 : f32
    %29 = vector.broadcast %cst_12 : f32 to vector<2x64xf32>
    %30 = arith.addf %29, %28 : vector<2x64xf32>
    %31 = arith.divf %29, %30 : vector<2x64xf32>
    %32 = vector.extract_strided_slice %13 {offsets = [0, 128], sizes = [2, 64], strides = [1, 1]} : vector<2x192xf32> to vector<2x64xf32>
    %33 = vector.extract_strided_slice %15 {offsets = [0, 128], sizes = [2, 64], strides = [1, 1]} : vector<2x192xf32> to vector<2x64xf32>
    %34 = arith.mulf %23, %33 : vector<2x64xf32>
    %35 = arith.addf %32, %34 : vector<2x64xf32>
    %36 = math.tanh %35 : vector<2x64xf32>
    %cst_13 = arith.constant 1.000000e+00 : f32
    %37 = vector.broadcast %cst_13 : f32 to vector<2x64xf32>
    %38 = arith.subf %37, %31 : vector<2x64xf32>
    %39 = arith.mulf %38, %36 : vector<2x64xf32>
    %40 = arith.mulf %31, %11 : vector<2x64xf32>
    %41 = arith.addf %39, %40 : vector<2x64xf32>
    %c0_14 = arith.constant 0 : index
    %c0_15 = arith.constant 0 : index
    %c0_16 = arith.constant 0 : index
    %42 = vector.load %arg8[%c0_14, %c0_15, %c0_16] : memref<8x2x64xf32, #tpu.memory_space<vmem>>, vector<1x2x64xf32>
    %43 = vector.shape_cast %42 : vector<1x2x64xf32> to vector<2x64xf32>
    %44 = vector.shape_cast %41 : vector<2x64xf32> to vector<1x2x64xf32>
    tpu.vector_store %arg8[%c0_14, %c0_15, %c0_16], %44 {strides = array<i32>} : memref<8x2x64xf32, #tpu.memory_space<vmem>>, vector<1x2x64xf32>,
    %45 = vector.extract_strided_slice %6 {offsets = [1, 0, 0], sizes = [1, 2, 192], strides = [1, 1, 1]} : vector<8x2x192xf32> to vector<1x2x192xf32>
    %46 = vector.shape_cast %45 : vector<1x2x192xf32> to vector<2x192xf32>
    %cst_17 = arith.constant dense<0.000000e+00> : vector<2x192xf32>
    %47 = tpu.matmul %41, %7, %cst_17 {dimension_numbers = #tpu.dot_dimension_numbers<[1], [0], [0], [1], [0, 0, 1, 1], [], []>} : vector<2x64xf32>, vector<64x192xf32>, vector<2x192xf32> -> vector<2x192xf32>
    %48 = arith.addf %47, %10 : vector<2x192xf32>
    %49 = vector.extract_strided_slice %46 {offsets = [0, 0], sizes = [2, 64], strides = [1, 1]} : vector<2x192xf32> to vector<2x64xf32>
    %50 = vector.extract_strided_slice %48 {offsets = [0, 0], sizes = [2, 64], strides = [1, 1]} : vector<2x192xf32> to vector<2x64xf32>
    %51 = arith.addf %49, %50 : vector<2x64xf32>
    %52 = arith.negf %51 : vector<2x64xf32>
    %53 = math.exp %52 : vector<2x64xf32>
    %cst_18 = arith.constant 1.000000e+00 : f32
    %54 = vector.broadcast %cst_18 : f32 to vector<2x64xf32>
    %55 = arith.addf %54, %53 : vector<2x64xf32>
    %56 = arith.divf %54, %55 : vector<2x64xf32>
    %57 = vector.extract_strided_slice %46 {offsets = [0, 64], sizes = [2, 64], strides = [1, 1]} : vector<2x192xf32> to vector<2x64xf32>
    %58 = vector.extract_strided_slice %48 {offsets = [0, 64], sizes = [2, 64], strides = [1, 1]} : vector<2x192xf32> to vector<2x64xf32>
    %59 = arith.addf %57, %58 : vector<2x64xf32>
    %60 = arith.negf %59 : vector<2x64xf32>
    %61 = math.exp %60 : vector<2x64xf32>
    %cst_19 = arith.constant 1.000000e+00 : f32
    %62 = vector.broadcast %cst_19 : f32 to vector<2x64xf32>
    %63 = arith.addf %62, %61 : vector<2x64xf32>
    %64 = arith.divf %62, %63 : vector<2x64xf32>
    %65 = vector.extract_strided_slice %46 {offsets = [0, 128], sizes = [2, 64], strides = [1, 1]} : vector<2x192xf32> to vector<2x64xf32>
    %66 = vector.extract_strided_slice %48 {offsets = [0, 128], sizes = [2, 64], strides = [1, 1]} : vector<2x192xf32> to vector<2x64xf32>
    %67 = arith.mulf %56, %66 : vector<2x64xf32>
    %68 = arith.addf %65, %67 : vector<2x64xf32>
    %69 = math.tanh %68 : vector<2x64xf32>
    %cst_20 = arith.constant 1.000000e+00 : f32
    %70 = vector.broadcast %cst_20 : f32 to vector<2x64xf32>
    %71 = arith.subf %70, %64 : vector<2x64xf32>
    %72 = arith.mulf %71, %69 : vector<2x64xf32>
    %73 = arith.mulf %64, %41 : vector<2x64xf32>
    %74 = arith.addf %72, %73 : vector<2x64xf32>
    %c1 = arith.constant 1 : index
    %c0_21 = arith.constant 0 : index
    %c0_22 = arith.constant 0 : index
    %75 = vector.load %arg8[%c1, %c0_21, %c0_22] : memref<8x2x64xf32, #tpu.memory_space<vmem>>, vector<1x2x64xf32>
    %76 = vector.shape_cast %75 : vector<1x2x64xf32> to vector<2x64xf32>
    %77 = vector.shape_cast %74 : vector<2x64xf32> to vector<1x2x64xf32>
    tpu.vector_store %arg8[%c1, %c0_21, %c0_22], %77 {strides = array<i32>} : memref<8x2x64xf32, #tpu.memory_space<vmem>>, vector<1x2x64xf32>,
    %78 = vector.extract_strided_slice %6 {offsets = [2, 0, 0], sizes = [1, 2, 192], strides = [1, 1, 1]} : vector<8x2x192xf32> to vector<1x2x192xf32>
    %79 = vector.shape_cast %78 : vector<1x2x192xf32> to vector<2x192xf32>
    %cst_23 = arith.constant dense<0.000000e+00> : vector<2x192xf32>
    %80 = tpu.matmul %74, %7, %cst_23 {dimension_numbers = #tpu.dot_dimension_numbers<[1], [0], [0], [1], [0, 0, 1, 1], [], []>} : vector<2x64xf32>, vector<64x192xf32>, vector<2x192xf32> -> vector<2x192xf32>
    %81 = arith.addf %80, %10 : vector<2x192xf32>
    %82 = vector.extract_strided_slice %79 {offsets = [0, 0], sizes = [2, 64], strides = [1, 1]} : vector<2x192xf32> to vector<2x64xf32>
    %83 = vector.extract_strided_slice %81 {offsets = [0, 0], sizes = [2, 64], strides = [1, 1]} : vector<2x192xf32> to vector<2x64xf32>
    %84 = arith.addf %82, %83 : vector<2x64xf32>
    %85 = arith.negf %84 : vector<2x64xf32>
    %86 = math.exp %85 : vector<2x64xf32>
    %cst_24 = arith.constant 1.000000e+00 : f32
    %87 = vector.broadcast %cst_24 : f32 to vector<2x64xf32>
    %88 = arith.addf %87, %86 : vector<2x64xf32>
    %89 = arith.divf %87, %88 : vector<2x64xf32>
    %90 = vector.extract_strided_slice %79 {offsets = [0, 64], sizes = [2, 64], strides = [1, 1]} : vector<2x192xf32> to vector<2x64xf32>
    %91 = vector.extract_strided_slice %81 {offsets = [0, 64], sizes = [2, 64], strides = [1, 1]} : vector<2x192xf32> to vector<2x64xf32>
    %92 = arith.addf %90, %91 : vector<2x64xf32>
    %93 = arith.negf %92 : vector<2x64xf32>
    %94 = math.exp %93 : vector<2x64xf32>
    %cst_25 = arith.constant 1.000000e+00 : f32
    %95 = vector.broadcast %cst_25 : f32 to vector<2x64xf32>
    %96 = arith.addf %95, %94 : vector<2x64xf32>
    %97 = arith.divf %95, %96 : vector<2x64xf32>
    %98 = vector.extract_strided_slice %79 {offsets = [0, 128], sizes = [2, 64], strides = [1, 1]} : vector<2x192xf32> to vector<2x64xf32>
    %99 = vector.extract_strided_slice %81 {offsets = [0, 128], sizes = [2, 64], strides = [1, 1]} : vector<2x192xf32> to vector<2x64xf32>
    %100 = arith.mulf %89, %99 : vector<2x64xf32>
    %101 = arith.addf %98, %100 : vector<2x64xf32>
    %102 = math.tanh %101 : vector<2x64xf32>
    %cst_26 = arith.constant 1.000000e+00 : f32
    %103 = vector.broadcast %cst_26 : f32 to vector<2x64xf32>
    %104 = arith.subf %103, %97 : vector<2x64xf32>
    %105 = arith.mulf %104, %102 : vector<2x64xf32>
    %106 = arith.mulf %97, %74 : vector<2x64xf32>
    %107 = arith.addf %105, %106 : vector<2x64xf32>
    %c2 = arith.constant 2 : index
    %c0_27 = arith.constant 0 : index
    %c0_28 = arith.constant 0 : index
    %108 = vector.load %arg8[%c2, %c0_27, %c0_28] : memref<8x2x64xf32, #tpu.memory_space<vmem>>, vector<1x2x64xf32>
    %109 = vector.shape_cast %108 : vector<1x2x64xf32> to vector<2x64xf32>
    %110 = vector.shape_cast %107 : vector<2x64xf32> to vector<1x2x64xf32>
    tpu.vector_store %arg8[%c2, %c0_27, %c0_28], %110 {strides = array<i32>} : memref<8x2x64xf32, #tpu.memory_space<vmem>>, vector<1x2x64xf32>,
    %111 = vector.extract_strided_slice %6 {offsets = [3, 0, 0], sizes = [1, 2, 192], strides = [1, 1, 1]} : vector<8x2x192xf32> to vector<1x2x192xf32>
    %112 = vector.shape_cast %111 : vector<1x2x192xf32> to vector<2x192xf32>
    %cst_29 = arith.constant dense<0.000000e+00> : vector<2x192xf32>
    %113 = tpu.matmul %107, %7, %cst_29 {dimension_numbers = #tpu.dot_dimension_numbers<[1], [0], [0], [1], [0, 0, 1, 1], [], []>} : vector<2x64xf32>, vector<64x192xf32>, vector<2x192xf32> -> vector<2x192xf32>
    %114 = arith.addf %113, %10 : vector<2x192xf32>
    %115 = vector.extract_strided_slice %112 {offsets = [0, 0], sizes = [2, 64], strides = [1, 1]} : vector<2x192xf32> to vector<2x64xf32>
    %116 = vector.extract_strided_slice %114 {offsets = [0, 0], sizes = [2, 64], strides = [1, 1]} : vector<2x192xf32> to vector<2x64xf32>
    %117 = arith.addf %115, %116 : vector<2x64xf32>
    %118 = arith.negf %117 : vector<2x64xf32>
    %119 = math.exp %118 : vector<2x64xf32>
    %cst_30 = arith.constant 1.000000e+00 : f32
    %120 = vector.broadcast %cst_30 : f32 to vector<2x64xf32>
    %121 = arith.addf %120, %119 : vector<2x64xf32>
    %122 = arith.divf %120, %121 : vector<2x64xf32>
    %123 = vector.extract_strided_slice %112 {offsets = [0, 64], sizes = [2, 64], strides = [1, 1]} : vector<2x192xf32> to vector<2x64xf32>
    %124 = vector.extract_strided_slice %114 {offsets = [0, 64], sizes = [2, 64], strides = [1, 1]} : vector<2x192xf32> to vector<2x64xf32>
    %125 = arith.addf %123, %124 : vector<2x64xf32>
    %126 = arith.negf %125 : vector<2x64xf32>
    %127 = math.exp %126 : vector<2x64xf32>
    %cst_31 = arith.constant 1.000000e+00 : f32
    %128 = vector.broadcast %cst_31 : f32 to vector<2x64xf32>
    %129 = arith.addf %128, %127 : vector<2x64xf32>
    %130 = arith.divf %128, %129 : vector<2x64xf32>
    %131 = vector.extract_strided_slice %112 {offsets = [0, 128], sizes = [2, 64], strides = [1, 1]} : vector<2x192xf32> to vector<2x64xf32>
    %132 = vector.extract_strided_slice %114 {offsets = [0, 128], sizes = [2, 64], strides = [1, 1]} : vector<2x192xf32> to vector<2x64xf32>
    %133 = arith.mulf %122, %132 : vector<2x64xf32>
    %134 = arith.addf %131, %133 : vector<2x64xf32>
    %135 = math.tanh %134 : vector<2x64xf32>
    %cst_32 = arith.constant 1.000000e+00 : f32
    %136 = vector.broadcast %cst_32 : f32 to vector<2x64xf32>
    %137 = arith.subf %136, %130 : vector<2x64xf32>
    %138 = arith.mulf %137, %135 : vector<2x64xf32>
    %139 = arith.mulf %130, %107 : vector<2x64xf32>
    %140 = arith.addf %138, %139 : vector<2x64xf32>
    %c3 = arith.constant 3 : index
    %c0_33 = arith.constant 0 : index
    %c0_34 = arith.constant 0 : index
    %141 = vector.load %arg8[%c3, %c0_33, %c0_34] : memref<8x2x64xf32, #tpu.memory_space<vmem>>, vector<1x2x64xf32>
    %142 = vector.shape_cast %141 : vector<1x2x64xf32> to vector<2x64xf32>
    %143 = vector.shape_cast %140 : vector<2x64xf32> to vector<1x2x64xf32>
    tpu.vector_store %arg8[%c3, %c0_33, %c0_34], %143 {strides = array<i32>} : memref<8x2x64xf32, #tpu.memory_space<vmem>>, vector<1x2x64xf32>,
    %144 = vector.extract_strided_slice %6 {offsets = [4, 0, 0], sizes = [1, 2, 192], strides = [1, 1, 1]} : vector<8x2x192xf32> to vector<1x2x192xf32>
    %145 = vector.shape_cast %144 : vector<1x2x192xf32> to vector<2x192xf32>
    %cst_35 = arith.constant dense<0.000000e+00> : vector<2x192xf32>
    %146 = tpu.matmul %140, %7, %cst_35 {dimension_numbers = #tpu.dot_dimension_numbers<[1], [0], [0], [1], [0, 0, 1, 1], [], []>} : vector<2x64xf32>, vector<64x192xf32>, vector<2x192xf32> -> vector<2x192xf32>
    %147 = arith.addf %146, %10 : vector<2x192xf32>
    %148 = vector.extract_strided_slice %145 {offsets = [0, 0], sizes = [2, 64], strides = [1, 1]} : vector<2x192xf32> to vector<2x64xf32>
    %149 = vector.extract_strided_slice %147 {offsets = [0, 0], sizes = [2, 64], strides = [1, 1]} : vector<2x192xf32> to vector<2x64xf32>
    %150 = arith.addf %148, %149 : vector<2x64xf32>
    %151 = arith.negf %150 : vector<2x64xf32>
    %152 = math.exp %151 : vector<2x64xf32>
    %cst_36 = arith.constant 1.000000e+00 : f32
    %153 = vector.broadcast %cst_36 : f32 to vector<2x64xf32>
    %154 = arith.addf %153, %152 : vector<2x64xf32>
    %155 = arith.divf %153, %154 : vector<2x64xf32>
    %156 = vector.extract_strided_slice %145 {offsets = [0, 64], sizes = [2, 64], strides = [1, 1]} : vector<2x192xf32> to vector<2x64xf32>
    %157 = vector.extract_strided_slice %147 {offsets = [0, 64], sizes = [2, 64], strides = [1, 1]} : vector<2x192xf32> to vector<2x64xf32>
    %158 = arith.addf %156, %157 : vector<2x64xf32>
    %159 = arith.negf %158 : vector<2x64xf32>
    %160 = math.exp %159 : vector<2x64xf32>
    %cst_37 = arith.constant 1.000000e+00 : f32
    %161 = vector.broadcast %cst_37 : f32 to vector<2x64xf32>
    %162 = arith.addf %161, %160 : vector<2x64xf32>
    %163 = arith.divf %161, %162 : vector<2x64xf32>
    %164 = vector.extract_strided_slice %145 {offsets = [0, 128], sizes = [2, 64], strides = [1, 1]} : vector<2x192xf32> to vector<2x64xf32>
    %165 = vector.extract_strided_slice %147 {offsets = [0, 128], sizes = [2, 64], strides = [1, 1]} : vector<2x192xf32> to vector<2x64xf32>
    %166 = arith.mulf %155, %165 : vector<2x64xf32>
    %167 = arith.addf %164, %166 : vector<2x64xf32>
    %168 = math.tanh %167 : vector<2x64xf32>
    %cst_38 = arith.constant 1.000000e+00 : f32
    %169 = vector.broadcast %cst_38 : f32 to vector<2x64xf32>
    %170 = arith.subf %169, %163 : vector<2x64xf32>
    %171 = arith.mulf %170, %168 : vector<2x64xf32>
    %172 = arith.mulf %163, %140 : vector<2x64xf32>
    %173 = arith.addf %171, %172 : vector<2x64xf32>
    %c4 = arith.constant 4 : index
    %c0_39 = arith.constant 0 : index
    %c0_40 = arith.constant 0 : index
    %174 = vector.load %arg8[%c4, %c0_39, %c0_40] : memref<8x2x64xf32, #tpu.memory_space<vmem>>, vector<1x2x64xf32>
    %175 = vector.shape_cast %174 : vector<1x2x64xf32> to vector<2x64xf32>
    %176 = vector.shape_cast %173 : vector<2x64xf32> to vector<1x2x64xf32>
    tpu.vector_store %arg8[%c4, %c0_39, %c0_40], %176 {strides = array<i32>} : memref<8x2x64xf32, #tpu.memory_space<vmem>>, vector<1x2x64xf32>,
    %177 = vector.extract_strided_slice %6 {offsets = [5, 0, 0], sizes = [1, 2, 192], strides = [1, 1, 1]} : vector<8x2x192xf32> to vector<1x2x192xf32>
    %178 = vector.shape_cast %177 : vector<1x2x192xf32> to vector<2x192xf32>
    %cst_41 = arith.constant dense<0.000000e+00> : vector<2x192xf32>
    %179 = tpu.matmul %173, %7, %cst_41 {dimension_numbers = #tpu.dot_dimension_numbers<[1], [0], [0], [1], [0, 0, 1, 1], [], []>} : vector<2x64xf32>, vector<64x192xf32>, vector<2x192xf32> -> vector<2x192xf32>
    %180 = arith.addf %179, %10 : vector<2x192xf32>
    %181 = vector.extract_strided_slice %178 {offsets = [0, 0], sizes = [2, 64], strides = [1, 1]} : vector<2x192xf32> to vector<2x64xf32>
    %182 = vector.extract_strided_slice %180 {offsets = [0, 0], sizes = [2, 64], strides = [1, 1]} : vector<2x192xf32> to vector<2x64xf32>
    %183 = arith.addf %181, %182 : vector<2x64xf32>
    %184 = arith.negf %183 : vector<2x64xf32>
    %185 = math.exp %184 : vector<2x64xf32>
    %cst_42 = arith.constant 1.000000e+00 : f32
    %186 = vector.broadcast %cst_42 : f32 to vector<2x64xf32>
    %187 = arith.addf %186, %185 : vector<2x64xf32>
    %188 = arith.divf %186, %187 : vector<2x64xf32>
    %189 = vector.extract_strided_slice %178 {offsets = [0, 64], sizes = [2, 64], strides = [1, 1]} : vector<2x192xf32> to vector<2x64xf32>
    %190 = vector.extract_strided_slice %180 {offsets = [0, 64], sizes = [2, 64], strides = [1, 1]} : vector<2x192xf32> to vector<2x64xf32>
    %191 = arith.addf %189, %190 : vector<2x64xf32>
    %192 = arith.negf %191 : vector<2x64xf32>
    %193 = math.exp %192 : vector<2x64xf32>
    %cst_43 = arith.constant 1.000000e+00 : f32
    %194 = vector.broadcast %cst_43 : f32 to vector<2x64xf32>
    %195 = arith.addf %194, %193 : vector<2x64xf32>
    %196 = arith.divf %194, %195 : vector<2x64xf32>
    %197 = vector.extract_strided_slice %178 {offsets = [0, 128], sizes = [2, 64], strides = [1, 1]} : vector<2x192xf32> to vector<2x64xf32>
    %198 = vector.extract_strided_slice %180 {offsets = [0, 128], sizes = [2, 64], strides = [1, 1]} : vector<2x192xf32> to vector<2x64xf32>
    %199 = arith.mulf %188, %198 : vector<2x64xf32>
    %200 = arith.addf %197, %199 : vector<2x64xf32>
    %201 = math.tanh %200 : vector<2x64xf32>
    %cst_44 = arith.constant 1.000000e+00 : f32
    %202 = vector.broadcast %cst_44 : f32 to vector<2x64xf32>
    %203 = arith.subf %202, %196 : vector<2x64xf32>
    %204 = arith.mulf %203, %201 : vector<2x64xf32>
    %205 = arith.mulf %196, %173 : vector<2x64xf32>
    %206 = arith.addf %204, %205 : vector<2x64xf32>
    %c5 = arith.constant 5 : index
    %c0_45 = arith.constant 0 : index
    %c0_46 = arith.constant 0 : index
    %207 = vector.load %arg8[%c5, %c0_45, %c0_46] : memref<8x2x64xf32, #tpu.memory_space<vmem>>, vector<1x2x64xf32>
    %208 = vector.shape_cast %207 : vector<1x2x64xf32> to vector<2x64xf32>
    %209 = vector.shape_cast %206 : vector<2x64xf32> to vector<1x2x64xf32>
    tpu.vector_store %arg8[%c5, %c0_45, %c0_46], %209 {strides = array<i32>} : memref<8x2x64xf32, #tpu.memory_space<vmem>>, vector<1x2x64xf32>,
    %210 = vector.extract_strided_slice %6 {offsets = [6, 0, 0], sizes = [1, 2, 192], strides = [1, 1, 1]} : vector<8x2x192xf32> to vector<1x2x192xf32>
    %211 = vector.shape_cast %210 : vector<1x2x192xf32> to vector<2x192xf32>
    %cst_47 = arith.constant dense<0.000000e+00> : vector<2x192xf32>
    %212 = tpu.matmul %206, %7, %cst_47 {dimension_numbers = #tpu.dot_dimension_numbers<[1], [0], [0], [1], [0, 0, 1, 1], [], []>} : vector<2x64xf32>, vector<64x192xf32>, vector<2x192xf32> -> vector<2x192xf32>
    %213 = arith.addf %212, %10 : vector<2x192xf32>
    %214 = vector.extract_strided_slice %211 {offsets = [0, 0], sizes = [2, 64], strides = [1, 1]} : vector<2x192xf32> to vector<2x64xf32>
    %215 = vector.extract_strided_slice %213 {offsets = [0, 0], sizes = [2, 64], strides = [1, 1]} : vector<2x192xf32> to vector<2x64xf32>
    %216 = arith.addf %214, %215 : vector<2x64xf32>
    %217 = arith.negf %216 : vector<2x64xf32>
    %218 = math.exp %217 : vector<2x64xf32>
    %cst_48 = arith.constant 1.000000e+00 : f32
    %219 = vector.broadcast %cst_48 : f32 to vector<2x64xf32>
    %220 = arith.addf %219, %218 : vector<2x64xf32>
    %221 = arith.divf %219, %220 : vector<2x64xf32>
    %222 = vector.extract_strided_slice %211 {offsets = [0, 64], sizes = [2, 64], strides = [1, 1]} : vector<2x192xf32> to vector<2x64xf32>
    %223 = vector.extract_strided_slice %213 {offsets = [0, 64], sizes = [2, 64], strides = [1, 1]} : vector<2x192xf32> to vector<2x64xf32>
    %224 = arith.addf %222, %223 : vector<2x64xf32>
    %225 = arith.negf %224 : vector<2x64xf32>
    %226 = math.exp %225 : vector<2x64xf32>
    %cst_49 = arith.constant 1.000000e+00 : f32
    %227 = vector.broadcast %cst_49 : f32 to vector<2x64xf32>
    %228 = arith.addf %227, %226 : vector<2x64xf32>
    %229 = arith.divf %227, %228 : vector<2x64xf32>
    %230 = vector.extract_strided_slice %211 {offsets = [0, 128], sizes = [2, 64], strides = [1, 1]} : vector<2x192xf32> to vector<2x64xf32>
    %231 = vector.extract_strided_slice %213 {offsets = [0, 128], sizes = [2, 64], strides = [1, 1]} : vector<2x192xf32> to vector<2x64xf32>
    %232 = arith.mulf %221, %231 : vector<2x64xf32>
    %233 = arith.addf %230, %232 : vector<2x64xf32>
    %234 = math.tanh %233 : vector<2x64xf32>
    %cst_50 = arith.constant 1.000000e+00 : f32
    %235 = vector.broadcast %cst_50 : f32 to vector<2x64xf32>
    %236 = arith.subf %235, %229 : vector<2x64xf32>
    %237 = arith.mulf %236, %234 : vector<2x64xf32>
    %238 = arith.mulf %229, %206 : vector<2x64xf32>
    %239 = arith.addf %237, %238 : vector<2x64xf32>
    %c6 = arith.constant 6 : index
    %c0_51 = arith.constant 0 : index
    %c0_52 = arith.constant 0 : index
    %240 = vector.load %arg8[%c6, %c0_51, %c0_52] : memref<8x2x64xf32, #tpu.memory_space<vmem>>, vector<1x2x64xf32>
    %241 = vector.shape_cast %240 : vector<1x2x64xf32> to vector<2x64xf32>
    %242 = vector.shape_cast %239 : vector<2x64xf32> to vector<1x2x64xf32>
    tpu.vector_store %arg8[%c6, %c0_51, %c0_52], %242 {strides = array<i32>} : memref<8x2x64xf32, #tpu.memory_space<vmem>>, vector<1x2x64xf32>,
    %243 = vector.extract_strided_slice %6 {offsets = [7, 0, 0], sizes = [1, 2, 192], strides = [1, 1, 1]} : vector<8x2x192xf32> to vector<1x2x192xf32>
    %244 = vector.shape_cast %243 : vector<1x2x192xf32> to vector<2x192xf32>
    %cst_53 = arith.constant dense<0.000000e+00> : vector<2x192xf32>
    %245 = tpu.matmul %239, %7, %cst_53 {dimension_numbers = #tpu.dot_dimension_numbers<[1], [0], [0], [1], [0, 0, 1, 1], [], []>} : vector<2x64xf32>, vector<64x192xf32>, vector<2x192xf32> -> vector<2x192xf32>
    %246 = arith.addf %245, %10 : vector<2x192xf32>
    %247 = vector.extract_strided_slice %244 {offsets = [0, 0], sizes = [2, 64], strides = [1, 1]} : vector<2x192xf32> to vector<2x64xf32>
    %248 = vector.extract_strided_slice %246 {offsets = [0, 0], sizes = [2, 64], strides = [1, 1]} : vector<2x192xf32> to vector<2x64xf32>
    %249 = arith.addf %247, %248 : vector<2x64xf32>
    %250 = arith.negf %249 : vector<2x64xf32>
    %251 = math.exp %250 : vector<2x64xf32>
    %cst_54 = arith.constant 1.000000e+00 : f32
    %252 = vector.broadcast %cst_54 : f32 to vector<2x64xf32>
    %253 = arith.addf %252, %251 : vector<2x64xf32>
    %254 = arith.divf %252, %253 : vector<2x64xf32>
    %255 = vector.extract_strided_slice %244 {offsets = [0, 64], sizes = [2, 64], strides = [1, 1]} : vector<2x192xf32> to vector<2x64xf32>
    %256 = vector.extract_strided_slice %246 {offsets = [0, 64], sizes = [2, 64], strides = [1, 1]} : vector<2x192xf32> to vector<2x64xf32>
    %257 = arith.addf %255, %256 : vector<2x64xf32>
    %258 = arith.negf %257 : vector<2x64xf32>
    %259 = math.exp %258 : vector<2x64xf32>
    %cst_55 = arith.constant 1.000000e+00 : f32
    %260 = vector.broadcast %cst_55 : f32 to vector<2x64xf32>
    %261 = arith.addf %260, %259 : vector<2x64xf32>
    %262 = arith.divf %260, %261 : vector<2x64xf32>
    %263 = vector.extract_strided_slice %244 {offsets = [0, 128], sizes = [2, 64], strides = [1, 1]} : vector<2x192xf32> to vector<2x64xf32>
    %264 = vector.extract_strided_slice %246 {offsets = [0, 128], sizes = [2, 64], strides = [1, 1]} : vector<2x192xf32> to vector<2x64xf32>
    %265 = arith.mulf %254, %264 : vector<2x64xf32>
    %266 = arith.addf %263, %265 : vector<2x64xf32>
    %267 = math.tanh %266 : vector<2x64xf32>
    %cst_56 = arith.constant 1.000000e+00 : f32
    %268 = vector.broadcast %cst_56 : f32 to vector<2x64xf32>
    %269 = arith.subf %268, %262 : vector<2x64xf32>
    %270 = arith.mulf %269, %267 : vector<2x64xf32>
    %271 = arith.mulf %262, %239 : vector<2x64xf32>
    %272 = arith.addf %270, %271 : vector<2x64xf32>
    %c7 = arith.constant 7 : index
    %c0_57 = arith.constant 0 : index
    %c0_58 = arith.constant 0 : index
    %273 = vector.load %arg8[%c7, %c0_57, %c0_58] : memref<8x2x64xf32, #tpu.memory_space<vmem>>, vector<1x2x64xf32>
    %274 = vector.shape_cast %273 : vector<1x2x64xf32> to vector<2x64xf32>
    %275 = vector.shape_cast %272 : vector<2x64xf32> to vector<1x2x64xf32>
    tpu.vector_store %arg8[%c7, %c0_57, %c0_58], %275 {strides = array<i32>} : memref<8x2x64xf32, #tpu.memory_space<vmem>>, vector<1x2x64xf32>,
    %c0_59 = arith.constant 0 : index
    %c0_60 = arith.constant 0 : index
    %c0_61 = arith.constant 0 : index
    %276 = vector.load %arg8[%c0_59, %c0_60, %c0_61] : memref<8x2x64xf32, #tpu.memory_space<vmem>>, vector<8x2x64xf32>
    %277 = vector.shape_cast %276 : vector<8x2x64xf32> to vector<16x64xf32>
    %c0_62 = arith.constant 0 : index
    %c0_63 = arith.constant 0 : index
    %278 = vector.load %arg5[%c0_62, %c0_63] : memref<64x8xf32, #tpu.memory_space<vmem>>, vector<64x8xf32>
    %cst_64 = arith.constant dense<0.000000e+00> : vector<16x8xf32>
    %279 = tpu.matmul %277, %278, %cst_64 {dimension_numbers = #tpu.dot_dimension_numbers<[1], [0], [0], [1], [0, 0, 1, 1], [], []>} : vector<16x64xf32>, vector<64x8xf32>, vector<16x8xf32> -> vector<16x8xf32>
    %c0_65 = arith.constant 0 : index
    %c0_66 = arith.constant 0 : index
    %280 = vector.load %arg6[%c0_65, %c0_66] : memref<1x8xf32, #tpu.memory_space<vmem>>, vector<1x8xf32>
    %281 = vector.broadcast %280 : vector<1x8xf32> to vector<16x8xf32>
    %282 = arith.addf %279, %281 : vector<16x8xf32>
    %c0_67 = arith.constant 0 : index
    %c0_68 = arith.constant 0 : index
    %283 = vector.load %arg7[%c0_67, %c0_68] : memref<16x8xf32, #tpu.memory_space<vmem>>, vector<16x8xf32>
    tpu.vector_store %arg7[%c0_67, %c0_68], %282 {strides = array<i32>} : memref<16x8xf32, #tpu.memory_space<vmem>>, vector<16x8xf32>,
    return
  }
}

</mosaic_0001>

<bundles_post_ra>
// kernel: gru_model_forward.1
= control target key start
LH: loop header
LB: loop body
LE: loop exit
PB: predicated region body
PF: predicated region fallthrough
CT: control target
= control target key end

     0   :  { %v1456_v3 = vmov 0.0   ;;  %vm50_vm0 = vcmask 1043456   ;;  %vm43_vm1 = vcmask 31744   ;;  %v31_v28 = vlaneseq  ;;  %s1458_s16 = smov 64   ;;  %s1784_s3 = inlined_call_operand.vmem [shape: f32[64,192], index: 3, kind: input, shape index: {}]   ;;  %s1785_s1 = inlined_call_operand.vmem [shape: f32[4,192], index: 1, kind: input, shape index: {}]   ;;  %s1786_s0 = inlined_call_operand.vmem [shape: f32[16,4], index: 0, kind: input, shape index: {}]   ;;  %s1787_s2 = inlined_call_operand.vmem [shape: f32[1,192], index: 2, kind: input, shape index: {}]   ;;  %s1788_s4 = inlined_call_operand.vmem [shape: f32[1,192], index: 4, kind: input, shape index: {}]   ;;  %s1789_s5 = inlined_call_operand.vmem [shape: f32[64,8], index: 5, kind: input, shape index: {}]   ;;  %s1790_s6 = inlined_call_operand.vmem [shape: f32[1,8], index: 6, kind: input, shape index: {}]   ;;  %s1791_s7 = inlined_call_operand.vmem [shape: f32[16,8], index: 7, kind: output, shape index: {}]  }
   0x1   :  { %v181_v0 = vld [vmem:[%s1784_s3 + $0x8] sm:$0xff]  ;;  %v183_v1 = vld [vmem:[%s1784_s3 + $0x18] sm:$0xff]  ;;  %v180_v2 = vld [vmem:[%s1784_s3] sm:$0xff]  ;;  %119 = vmatprep.mubr.f32.mxu0 %v1456_v3  ;;  %276 = vmatprep.mubr.f32.mxu1 %v1456_v3  ;;  %v1457_v35 = vmov 1983009808   ;;  %vm314_vm2 = vcmask 517120  }
   0x2   :  { %v1510_v4 = vpack.c.bf16 %v183_v1, %v181_v0  ;;  %v182_v5 = vld [vmem:[%s1784_s3 + $0x10] sm:$0xff]  ;;  %v185_v6 = vld [vmem:[%s1784_s3 + $0x28] sm:$0xff]  ;;  %v187_v7 = vld [vmem:[%s1784_s3 + $0x38] sm:$0xff]  ;;  %v32_v29 = vshrl.u32 %v31_v28, 7  ;;  %v139_v36 = vunpack.c.l.s4 %v1457_v35  ;;  %vm208_vm3 = vcmask 523264  }
   0x3   :  { %v1521_v8 = vpack.c.bf16 %v182_v5, %v180_v2  ;;  %v1523_v9 = vpack.c.bf16 %v187_v7, %v185_v6  ;;  %v184_v10 = vld [vmem:[%s1784_s3 + $0x20] sm:$0xff]  ;;  %v186_v11 = vld [vmem:[%s1784_s3 + $0x30] sm:$0xff]  ;;  %v189_v14 = vld [vmem:[%s1784_s3 + $0x48] sm:$0xff]  ;;  %vm1202_vm4 = vcmask 64512  }
   0x4   :  { %v28_v12 = vld [vmem:[%s1785_s1] sm:$0xff]  ;;  %1261 = vmatprep.subr.bf16.mxu1 %v1510_v4  ;;  %v191_v15 = vld [vmem:[%s1784_s3 + $0x58] sm:$0xff]  ;;  %v1542_v16 = vpack.c.bf16 %v186_v11, %v184_v10  ;;  %v190_v20 = vld [vmem:[%s1784_s3 + $0x50] sm:$0xff]  ;;  %v33_v30 = vsub.s32 0, %v32_v29  ;;  %v37_v32 = vsub.s32 1, %v32_v29  ;;  %v140_v41 = vunpack.c.0.s8 %v139_v36 }
   0x5   :  { %v42_v13 = vcombine.high %v28_v12, %v28_v12  ;;  %1263 = vmatpush1.bf16.msra.mxu1 %v1521_v8  ;;  %v26_v17 = vld [vmem:[%s1786_s0] sm:$0xff]  ;;  %v1548_v18 = vpack.c.bf16 %v191_v15, %v189_v14  ;;  %v193_v21 = vld [vmem:[%s1784_s3 + $0x68] sm:$0xff]  ;;  %v195_v22 = vld [vmem:[%s1784_s3 + $0x78] sm:$0xff] }
   0x6   :  { %1265 = vmatprep.subr.bf16.mxu1 %v1523_v9  ;;  %v188_v19 = vld [vmem:[%s1784_s3 + $0x40] sm:$0xff]  ;;  %v1569_v24 = vpack.c.bf16 %v195_v22, %v193_v21  ;;  %v194_v26 = vld [vmem:[%s1784_s3 + $0x70] sm:$0xff]  ;;  %v1615_v45 = vsub.s32 %v140_v41, %v32_v29  ;;  %v27_v61 = vld [vmem:[%s1786_s0 + $0x8] sm:$0xff] }
   0x7   :  { %1209 = vmatprep.subr.msk.mxu0 %vm50_vm0, %v42_v13  ;;  %v1565_v23 = vpack.c.bf16 %v190_v20, %v188_v19  ;;  %v192_v25 = vld [vmem:[%s1784_s3 + $0x60] sm:$0xff] }
   0x8   :  { %1210 = vmatpush1.msk.msra.mxu0 %vm50_vm0, %v28_v12  ;;  %v1580_v27 = vpack.c.bf16 %v194_v26, %v192_v25  ;;  %v29_v31 = vld [vmem:[%s1787_s2] sm:$0x3] }
   0x9   :  { %1211 = vmatmul.mubr.msk.f32.vlgmr.msra.gmra.mrb[0].mxu0 %vm43_vm1, %v26_v17  ;;  %1277 = vmatprep.subr.bf16.mxu0 %v1510_v4  ;;  %v34_v33 = vrot.slane %v29_v31, %v33_v30  ;;  %v38_v34 = vrot.slane %v29_v31, %v37_v32  ;;  %v196_v44 = vld [vmem:[%s1788_s4] sm:$0x3] }
   0xa   :  { %1267 = vmatpush1.bf16.msra.mxu1 %v1542_v16  ;;  %1279 = vmatpush1.bf16.msra.mxu0 %v1521_v8  ;;  %v1617_v46 = vrot.slane %v196_v44, %v33_v30  ;;  %v1621_v55 = vrot.slane %v196_v44, %v37_v32 }
   0xb   :  { %1269 = vmatprep.subr.bf16.mxu1 %v1548_v18  ;;  %1281 = vmatprep.subr.bf16.mxu0 %v1523_v9 }
   0xc   :  { %125 = vmatprep.mubr.f32.mxu0 %v1456_v3 }
   0xd   :  { %1212 = vmatmul.mubr.msk.f32.gmra.mrb[2].mxu0 %vm43_vm1, %v27_v61 }
   0xe   :  { %1271 = vmatpush1.bf16.msra.mxu1 %v1565_v23  ;;  %1283 = vmatpush1.bf16.msra.mxu0 %v1542_v16 }
   0xf   :  { %1273 = vmatprep.subr.bf16.mxu1 %v1569_v24  ;;  %1285 = vmatprep.subr.bf16.mxu0 %v1548_v18 }
  0x10   :  { %382 = vmatprep.mubr.f32.mxu0 %v1456_v3 }
  0x12   :  { %1275 = vmatpush1.bf16.msra.mxu1 %v1580_v27  ;;  %1287 = vmatpush1.bf16.msra.mxu0 %v1565_v23 }
  0x13   :  { %1289 = vmatprep.subr.bf16.mxu0 %v1569_v24  ;;  %1293 = vmatprep.subr.bf16.mxu1 %v1510_v4 }
  0x15   :  { %277 = vmatmul.mubr.f32.vlgmr.msra.gmra.mrb[0].mxu1 %v1456_v3 }
  0x16   :  { %1291 = vmatpush1.bf16.msra.mxu0 %v1580_v27  ;;  %1295 = vmatpush1.bf16.msra.mxu1 %v1521_v8 }
  0x17   :  { %1297 = vmatprep.subr.bf16.mxu1 %v1523_v9  ;;  %488 = vmatprep.mubr.f32.mxu1 %v1456_v3 }
  0x18   :  { %1309 = vmatprep.subr.bf16.mxu0 %v1510_v4 }
  0x1a   :  { %1299 = vmatpush1.bf16.msra.mxu1 %v1542_v16 }
  0x1b   :  { %1301 = vmatprep.subr.bf16.mxu1 %v1548_v18 }
  0x1e   :  { %1303 = vmatpush1.bf16.msra.mxu1 %v1565_v23 }
  0x1f   :  { %1305 = vmatprep.subr.bf16.mxu1 %v1569_v24 }
  0x22   :  { %1307 = vmatpush1.bf16.msra.mxu1 %v1580_v27 }
  0x23   :  { %1325 = vmatprep.subr.bf16.mxu1 %v1510_v4 }
  0xdc   :  { %v121_v37 = vpop.f32.mrb[0].mxu0 }
  0xdd   :  { %v1604_v38 = vadd.f32 %v121_v37, %v34_v33  ;;  %v123_v39 = vpop.f32.mrb[1].mxu0 }
  0xde   :  { %v1606_v40 = vadd.f32 %v123_v39, %v38_v34 }
  0xe0   :  { %v136_v42 = vcombine.low %v1604_v38, %v1606_v40  ;;  %v137_v43 = vcombine.high %v1604_v38, %v1606_v40  ;;  %v127_v7 = vpop.f32.mrb[2].mxu0 }
  0xe1   :  { %v1632_v10 = vadd.f32 %v127_v7, %v34_v33  ;;  %v129_v11 = vpop.f32.mrb[3].mxu0 }
  0xe2   :  { %v144_v47 = vrot.slane %v136_v42, %v1615_v45  ;;  %v1634_v12 = vadd.f32 %v129_v11, %v38_v34 }
  0xe4   :  { %v291_v59 = vrot.slane %v144_v47, 2  ;;  %v154_v13 = vcombine.low %v1632_v10, %v1634_v12  ;;  %v155_v14 = vcombine.high %v1632_v10, %v1634_v12  ;;  %v152_v19 = vcombine.high %v144_v47, %v144_v47 }
  0xe6   :  { %v397_v32 = vrot.slane %v152_v19, 2 }
  0xe8   :  { %v278_v48 = vpop.f32.mrb[0].mxu1 }
  0xe9   :  { %v279_v49 = vadd.f32 %v278_v48, %v1617_v46  ;;  %v280_v50 = vpop.f32.mrb[1].mxu1  ;;  %v151_v48 = vrot.slane %v137_v43, %v1615_v45 }
  0xea   :  { %v281_v56 = vadd.f32 %v280_v50, %v1621_v55 }
  0xeb   :  { %v283_v51 = vadd.f32 %v279_v49, %v144_v47 }
  0xed   :  { %v1213_v52 = vmul.f32 -1.442695, %v283_v51 }
  0xef   :  { %1408 = vpow2.f32 %v1213_v52 }
  0xf9   :  { %v1409_v53 = vpop.eup %1408 }
  0xfa   :  { %v287_v54 = vadd.f32 1.0, %v1409_v53 }
  0xfc   :  { %1410 = vrcp.f32 %v287_v54 }
 0x106   :  { %v1411_v57 = vpop.eup %1410 }
 0x107   :  { %v290_v58 = vmul.f32 %v1411_v57, %v281_v56  ;;  %v295_v63 = vsub.f32 1.0, %v1411_v57  ;;  %v301_v1 = vmul.f32 0.0, %v1411_v57 }
 0x109   :  { %v293_v60 = vadd.f32 %v291_v59, %v290_v58  ;;  %v503_v59 = vrot.slane %v151_v48, 2 }
 0x10b   :  { %1412 = vtanh.f32 %v293_v60 }
 0x115   :  { %v1413_v62 = vpop.eup %1412 }
 0x116   :  { %297 = vrot.lane.b32.xlu0 %v1413_v62, %s1458_s16 }
 0x188   :  { %v298_v0 = vpop.permute.xlu0 %297 }
 0x189   :  { %v300_v2 = vmul.f32 %v298_v0, %v295_v63 }
 0x18b   :  { %v302_v5 = vadd.f32 %v301_v1, %v300_v2 }
 0x18d   :  { %v310_v6 = vrot.slane %v302_v5, %v1615_v45 }
 0x18f   :  { %311 = vrot.lane.b32.xlu0 %v310_v6, %s1458_s16 }
 0x201   :  { %v312_v15 = vpop.permute.xlu0 %311 }
 0x202   :  { %315 = vst.msk [vmem:[#allocation2] sm:$0x3] %vm314_vm2, %v312_v15  ;;  %1214 = vmatmul.mubr.msk.f32.vlgmr.msra.gmra.mrb[4].mxu0 %vm208_vm3, %v312_v15 }
 0x203   :  { %1311 = vmatpush1.bf16.msra.mxu0 %v1521_v8  ;;  %594 = vmatprep.mubr.f32.mxu0 %v1456_v3 }
 0x204   :  { %1313 = vmatprep.subr.bf16.mxu0 %v1523_v9 }
 0x207   :  { %1315 = vmatpush1.bf16.msra.mxu0 %v1542_v16 }
 0x208   :  { %1317 = vmatprep.subr.bf16.mxu0 %v1548_v18 }
 0x20b   :  { %1319 = vmatpush1.bf16.msra.mxu0 %v1565_v23 }
 0x20c   :  { %1321 = vmatprep.subr.bf16.mxu0 %v1569_v24 }
 0x20f   :  { %1323 = vmatpush1.bf16.msra.mxu0 %v1580_v27 }
 0x210   :  { %1341 = vmatprep.subr.bf16.mxu0 %v1510_v4 }
 0x2d5   :  { %v384_v17 = vpop.f32.mrb[4].mxu0 }
 0x2d6   :  { %v385_v20 = vadd.f32 %v384_v17, %v1617_v46  ;;  %v386_v21 = vpop.f32.mrb[5].mxu0 }
 0x2d7   :  { %v387_v29 = vadd.f32 %v386_v21, %v1621_v55 }
 0x2d8   :  { %v389_v22 = vadd.f32 %v385_v20, %v152_v19 }
 0x2da   :  { %v1215_v25 = vmul.f32 -1.442695, %v389_v22 }
 0x2dc   :  { %1414 = vpow2.f32 %v1215_v25 }
 0x2e6   :  { %v1415_v26 = vpop.eup %1414 }
 0x2e7   :  { %v393_v28 = vadd.f32 1.0, %v1415_v26 }
 0x2e9   :  { %1416 = vrcp.f32 %v393_v28 }
 0x2f3   :  { %v1417_v30 = vpop.eup %1416 }
 0x2f4   :  { %v396_v31 = vmul.f32 %v1417_v30, %v387_v29  ;;  %v401_v35 = vsub.f32 1.0, %v1417_v30  ;;  %v407_v37 = vmul.f32 %v1417_v30, %v302_v5  ;;  %v153_v5 = vcombine.high %v151_v48, %v151_v48 }
 0x2f6   :  { %v399_v33 = vadd.f32 %v397_v32, %v396_v31  ;;  %v609_v25 = vrot.slane %v153_v5, 2 }
 0x2f8   :  { %1418 = vtanh.f32 %v399_v33 }
 0x302   :  { %v1419_v34 = vpop.eup %1418 }
 0x303   :  { %403 = vrot.lane.b32.xlu1 %v1419_v34, %s1458_s16 }
 0x375   :  { %v404_v36 = vpop.permute.xlu1 %403 }
 0x376   :  { %v406_v39 = vmul.f32 %v404_v36, %v401_v35  ;;  %v162_v36 = vrot.slane %v154_v13, %v1615_v45 }
 0x378   :  { %v408_v41 = vadd.f32 %v407_v37, %v406_v39 }
 0x37a   :  { %v416_v42 = vrot.slane %v408_v41, %v1615_v45 }
 0x37c   :  { %417 = vrot.lane.b32.xlu1 %v416_v42, %s1458_s16 }
 0x3ee   :  { %v418_v44 = vpop.permute.xlu1 %417 }
 0x3ef   :  { %421 = vst.msk [vmem:[#allocation2 + $0x2] sm:$0x3] %vm314_vm2, %v418_v44  ;;  %1216 = vmatmul.mubr.msk.f32.vlgmr.msra.gmra.mrb[2].mxu1 %vm208_vm3, %v418_v44 }
 0x3f0   :  { %1327 = vmatpush1.bf16.msra.mxu1 %v1521_v8  ;;  %700 = vmatprep.mubr.f32.mxu1 %v1456_v3 }
 0x3f1   :  { %1329 = vmatprep.subr.bf16.mxu1 %v1523_v9 }
 0x3f4   :  { %1331 = vmatpush1.bf16.msra.mxu1 %v1542_v16 }
 0x3f5   :  { %1333 = vmatprep.subr.bf16.mxu1 %v1548_v18 }
 0x3f8   :  { %1335 = vmatpush1.bf16.msra.mxu1 %v1565_v23 }
 0x3f9   :  { %1337 = vmatprep.subr.bf16.mxu1 %v1569_v24 }
 0x3fc   :  { %1339 = vmatpush1.bf16.msra.mxu1 %v1580_v27 }
 0x3fd   :  { %1357 = vmatprep.subr.bf16.mxu1 %v1510_v4 }
 0x4c2   :  { %v490_v47 = vpop.f32.mrb[2].mxu1 }
 0x4c3   :  { %v491_v49 = vadd.f32 %v490_v47, %v1617_v46  ;;  %v492_v50 = vpop.f32.mrb[3].mxu1 }
 0x4c4   :  { %v493_v56 = vadd.f32 %v492_v50, %v1621_v55 }
 0x4c5   :  { %v495_v51 = vadd.f32 %v491_v49, %v151_v48 }
 0x4c7   :  { %v1217_v52 = vmul.f32 -1.442695, %v495_v51  ;;  %v715_v51 = vrot.slane %v162_v36, 2 }
 0x4c9   :  { %1420 = vpow2.f32 %v1217_v52 }
 0x4d3   :  { %v1421_v53 = vpop.eup %1420 }
 0x4d4   :  { %v499_v54 = vadd.f32 1.0, %v1421_v53 }
 0x4d6   :  { %1422 = vrcp.f32 %v499_v54 }
 0x4e0   :  { %v1423_v57 = vpop.eup %1422 }
 0x4e1   :  { %v502_v58 = vmul.f32 %v1423_v57, %v493_v56  ;;  %v507_v38 = vsub.f32 1.0, %v1423_v57  ;;  %v513_v43 = vmul.f32 %v1423_v57, %v408_v41 }
 0x4e3   :  { %v505_v60 = vadd.f32 %v503_v59, %v502_v58 }
 0x4e5   :  { %1424 = vtanh.f32 %v505_v60 }
 0x4ef   :  { %v1425_v61 = vpop.eup %1424 }
 0x4f0   :  { %509 = vrot.lane.b32.xlu0 %v1425_v61, %s1458_s16 }
 0x562   :  { %v510_v40 = vpop.permute.xlu0 %509 }
 0x563   :  { %v512_v62 = vmul.f32 %v510_v40, %v507_v38  ;;  %v170_v38 = vcombine.high %v162_v36, %v162_v36 }
 0x565   :  { %v514_v63 = vadd.f32 %v513_v43, %v512_v62 }
 0x567   :  { %v522_v0 = vrot.slane %v514_v63, %v1615_v45 }
 0x569   :  { %523 = vrot.lane.b32.xlu1 %v522_v0, %s1458_s16 }
 0x5db   :  { %v524_v1 = vpop.permute.xlu1 %523 }
 0x5dc   :  { %527 = vst.msk [vmem:[#allocation2 + $0x4] sm:$0x3] %vm314_vm2, %v524_v1  ;;  %1218 = vmatmul.mubr.msk.f32.vlgmr.msra.gmra.mrb[6].mxu0 %vm208_vm3, %v524_v1 }
 0x5dd   :  { %1343 = vmatpush1.bf16.msra.mxu0 %v1521_v8  ;;  %806 = vmatprep.mubr.f32.mxu0 %v1456_v3 }
 0x5de   :  { %1345 = vmatprep.subr.bf16.mxu0 %v1523_v9 }
 0x5e1   :  { %1347 = vmatpush1.bf16.msra.mxu0 %v1542_v16 }
 0x5e2   :  { %1349 = vmatprep.subr.bf16.mxu0 %v1548_v18 }
 0x5e5   :  { %1351 = vmatpush1.bf16.msra.mxu0 %v1565_v23 }
 0x5e6   :  { %1353 = vmatprep.subr.bf16.mxu0 %v1569_v24 }
 0x5e9   :  { %1355 = vmatpush1.bf16.msra.mxu0 %v1580_v27 }
 0x5ea   :  { %1373 = vmatprep.subr.bf16.mxu0 %v1510_v4 }
 0x6af   :  { %v596_v2 = vpop.f32.mrb[6].mxu0 }
 0x6b0   :  { %v597_v6 = vadd.f32 %v596_v2, %v1617_v46  ;;  %v598_v7 = vpop.f32.mrb[7].mxu0 }
 0x6b1   :  { %v599_v20 = vadd.f32 %v598_v7, %v1621_v55 }
 0x6b2   :  { %v601_v11 = vadd.f32 %v597_v6, %v153_v5 }
 0x6b4   :  { %v1219_v15 = vmul.f32 -1.442695, %v601_v11 }
 0x6b6   :  { %1426 = vpow2.f32 %v1219_v15  ;;  %v1059_v15 = vld [vmem:[#allocation2 + $0x2] sm:$0x3] }
 0x6c0   :  { %v1427_v17 = vpop.eup %1426 }
 0x6c1   :  { %v605_v19 = vadd.f32 1.0, %v1427_v17  ;;  %v1060_v17 = vld [vmem:[#allocation2 + $0x4] sm:$0x3] }
 0x6c3   :  { %1428 = vrcp.f32 %v605_v19 }
 0x6cd   :  { %v1429_v21 = vpop.eup %1428 }
 0x6ce   :  { %v608_v22 = vmul.f32 %v1429_v21, %v599_v20  ;;  %v613_v4 = vsub.f32 1.0, %v1429_v21  ;;  %v619_v30 = vmul.f32 %v1429_v21, %v514_v63  ;;  %v1058_v20 = vld [vmem:[#allocation2] sm:$0x3] }
 0x6cf   :  { %v1089_v21 = vcombine.low %v1058_v20, %v1059_v15 }
 0x6d0   :  { %v611_v26 = vadd.f32 %v609_v25, %v608_v22 }
 0x6d1   :  { %v1097_v25 = vrot.slane %v1089_v21, %v1615_v45 }
 0x6d2   :  { %1430 = vtanh.f32 %v611_v26 }
 0x6dc   :  { %v1431_v28 = vpop.eup %1430 }
 0x6dd   :  { %615 = vrot.lane.b32.xlu0 %v1431_v28, %s1458_s16 }
 0x74f   :  { %v616_v29 = vpop.permute.xlu0 %615 }
 0x750   :  { %v618_v31 = vmul.f32 %v616_v29, %v613_v4  ;;  %v169_v29 = vrot.slane %v155_v14, %v1615_v45 }
 0x752   :  { %v620_v32 = vadd.f32 %v619_v30, %v618_v31 }
 0x754   :  { %v628_v33 = vrot.slane %v620_v32, %v1615_v45 }
 0x756   :  { %629 = vrot.lane.b32.xlu1 %v628_v33, %s1458_s16 }
 0x7c8   :  { %v630_v34 = vpop.permute.xlu1 %629 }
 0x7c9   :  { %633 = vst.msk [vmem:[#allocation2 + $0x6] sm:$0x3] %vm314_vm2, %v630_v34  ;;  %1220 = vmatmul.mubr.msk.f32.vlgmr.msra.gmra.mrb[4].mxu1 %vm208_vm3, %v630_v34 }
 0x7ca   :  { %1359 = vmatpush1.bf16.msra.mxu1 %v1521_v8  ;;  %912 = vmatprep.mubr.f32.mxu1 %v1456_v3 }
 0x7cb   :  { %1361 = vmatprep.subr.bf16.mxu1 %v1523_v9 }
 0x7ce   :  { %1363 = vmatpush1.bf16.msra.mxu1 %v1542_v16 }
 0x7cf   :  { %1365 = vmatprep.subr.bf16.mxu1 %v1548_v18 }
 0x7d0   :  { %v1061_v11 = vld [vmem:[#allocation2 + $0x6] sm:$0x3] }
 0x7d1   :  { %v1090_v19 = vcombine.low %v1060_v17, %v1061_v11 }
 0x7d2   :  { %1367 = vmatpush1.bf16.msra.mxu1 %v1565_v23 }
 0x7d3   :  { %1369 = vmatprep.subr.bf16.mxu1 %v1569_v24  ;;  %v1104_v22 = vrot.slane %v1090_v19, %v1615_v45 }
 0x7d5   :  { %v1105_v28 = vcombine.low %v1097_v25, %v1104_v22 }
 0x7d6   :  { %1371 = vmatpush1.bf16.msra.mxu1 %v1580_v27 }
 0x89c   :  { %v702_v35 = vpop.f32.mrb[4].mxu1 }
 0x89d   :  { %v703_v37 = vadd.f32 %v702_v35, %v1617_v46  ;;  %v704_v39 = vpop.f32.mrb[5].mxu1 }
 0x89e   :  { %v705_v48 = vadd.f32 %v704_v39, %v1621_v55 }
 0x89f   :  { %v707_v41 = vadd.f32 %v703_v37, %v162_v36 }
 0x8a1   :  { %v1221_v42 = vmul.f32 -1.442695, %v707_v41  ;;  %v927_v41 = vrot.slane %v169_v29, 2 }
 0x8a3   :  { %1432 = vpow2.f32 %v1221_v42 }
 0x8ad   :  { %v1433_v44 = vpop.eup %1432 }
 0x8ae   :  { %v711_v47 = vadd.f32 1.0, %v1433_v44 }
 0x8b0   :  { %1434 = vrcp.f32 %v711_v47 }
 0x8ba   :  { %v1435_v49 = vpop.eup %1434 }
 0x8bb   :  { %v714_v50 = vmul.f32 %v1435_v49, %v705_v48  ;;  %v719_v13 = vsub.f32 1.0, %v1435_v49  ;;  %v725_v56 = vmul.f32 %v1435_v49, %v620_v32 }
 0x8bd   :  { %v717_v52 = vadd.f32 %v715_v51, %v714_v50 }
 0x8bf   :  { %1436 = vtanh.f32 %v717_v52  ;;  %v171_v52 = vcombine.high %v169_v29, %v169_v29 }
 0x8c9   :  { %v1437_v53 = vpop.eup %1436 }
 0x8ca   :  { %721 = vrot.lane.b32.xlu0 %v1437_v53, %s1458_s16 }
 0x93c   :  { %v722_v54 = vpop.permute.xlu0 %721 }
 0x93d   :  { %v724_v57 = vmul.f32 %v722_v54, %v719_v13 }
 0x93f   :  { %v726_v58 = vadd.f32 %v725_v56, %v724_v57 }
 0x941   :  { %v734_v59 = vrot.slane %v726_v58, %v1615_v45 }
 0x943   :  { %735 = vrot.lane.b32.xlu1 %v734_v59, %s1458_s16 }
 0x9b5   :  { %v736_v60 = vpop.permute.xlu1 %735 }
 0x9b6   :  { %739 = vst.msk [vmem:[#allocation2 + $0x8] sm:$0x3] %vm314_vm2, %v736_v60  ;;  %1222 = vmatmul.mubr.msk.f32.vlgmr.msra.gmra.mrb[8].mxu0 %vm208_vm3, %v736_v60 }
 0x9b7   :  { %1375 = vmatpush1.bf16.msra.mxu0 %v1521_v8  ;;  %1018 = vmatprep.mubr.f32.mxu0 %v1456_v3 }
 0x9b8   :  { %1377 = vmatprep.subr.bf16.mxu0 %v1523_v9 }
 0x9bb   :  { %1379 = vmatpush1.bf16.msra.mxu0 %v1542_v16 }
 0x9bc   :  { %1381 = vmatprep.subr.bf16.mxu0 %v1548_v18 }
 0x9bd   :  { %v1062_v17 = vld [vmem:[#allocation2 + $0x8] sm:$0x3] }
 0x9bf   :  { %1383 = vmatpush1.bf16.msra.mxu0 %v1565_v23  ;;  %v821_v23 = vrot.slane %v170_v38, 2 }
 0x9c0   :  { %1385 = vmatprep.subr.bf16.mxu0 %v1569_v24 }
 0x9c3   :  { %1387 = vmatpush1.bf16.msra.mxu0 %v1580_v27 }
 0xa89   :  { %v808_v61 = vpop.f32.mrb[8].mxu0 }
 0xa8a   :  { %v809_v40 = vadd.f32 %v808_v61, %v1617_v46  ;;  %v810_v43 = vpop.f32.mrb[9].mxu0 }
 0xa8b   :  { %v811_v16 = vadd.f32 %v810_v43, %v1621_v55  ;;  %v1066_v43 = vld [vmem:[%s1789_s5] sm:$0xff] }
 0xa8c   :  { %v813_v8 = vadd.f32 %v809_v40, %v170_v38  ;;  %v1033_v38 = vrot.slane %v171_v52, 2 }
 0xa8e   :  { %v1223_v62 = vmul.f32 -1.442695, %v813_v8 }
 0xa90   :  { %1438 = vpow2.f32 %v1223_v62 }
 0xa9a   :  { %v1439_v3 = vpop.eup %1438 }
 0xa9b   :  { %v817_v9 = vadd.f32 1.0, %v1439_v3  ;;  %v1069_v3 = vld [vmem:[%s1789_s5 + $0x18] sm:$0xff] }
 0xa9d   :  { %1440 = vrcp.f32 %v817_v9 }
 0xaa7   :  { %v1441_v18 = vpop.eup %1440 }
 0xaa8   :  { %v820_v63 = vmul.f32 %v1441_v18, %v811_v16  ;;  %v825_v27 = vsub.f32 1.0, %v1441_v18  ;;  %v831_v2 = vmul.f32 %v1441_v18, %v726_v58  ;;  %v1070_v16 = vld [vmem:[%s1789_s5 + $0x20] sm:$0xff]  ;;  %v1071_v18 = vld [vmem:[%s1789_s5 + $0x28] sm:$0xff] }
 0xaaa   :  { %v823_v0 = vadd.f32 %v821_v23, %v820_v63  ;;  %v1396_v63 = vpack.c.bf16 %v1071_v18, %v1070_v16  ;;  %v1072_v23 = vld [vmem:[%s1789_s5 + $0x30] sm:$0xff] }
 0xaac   :  { %1442 = vtanh.f32 %v823_v0  ;;  %v1073_v0 = vld [vmem:[%s1789_s5 + $0x38] sm:$0xff] }
 0xab6   :  { %v1443_v24 = vpop.eup %1442 }
 0xab7   :  { %827 = vrot.lane.b32.xlu0 %v1443_v24, %s1458_s16  ;;  %v1400_v24 = vpack.c.bf16 %v1073_v0, %v1072_v23 }
 0xb29   :  { %v828_v1 = vpop.permute.xlu0 %827 }
 0xb2a   :  { %v830_v5 = vmul.f32 %v828_v1, %v825_v27 }
 0xb2c   :  { %v832_v6 = vadd.f32 %v831_v2, %v830_v5 }
 0xb2e   :  { %v840_v7 = vrot.slane %v832_v6, %v1615_v45 }
 0xb30   :  { %841 = vrot.lane.b32.xlu1 %v840_v7, %s1458_s16 }
 0xba2   :  { %v842_v26 = vpop.permute.xlu1 %841 }
 0xba3   :  { %845 = vst.msk [vmem:[#allocation2 + $0xa] sm:$0x3] %vm314_vm2, %v842_v26  ;;  %1224 = vmatmul.mubr.msk.f32.vlgmr.msra.gmra.mrb[6].mxu1 %vm208_vm3, %v842_v26 }
 0xba4   :  { %1257 = vmatprep.mubr.msk.f32.mxu1 %vm208_vm3, %v1105_v28 }
 0xbaa   :  { %v1063_v15 = vld [vmem:[#allocation2 + $0xa] sm:$0x3] }
 0xbab   :  { %v1106_v19 = vcombine.low %v1062_v17, %v1063_v15 }
 0xbad   :  { %v1114_v25 = vrot.slane %v1106_v19, %v1615_v45 }
 0xc76   :  { %v914_v4 = vpop.f32.mrb[6].mxu1 }
 0xc77   :  { %v915_v30 = vadd.f32 %v914_v4, %v1617_v46  ;;  %v916_v31 = vpop.f32.mrb[7].mxu1  ;;  %v1228_v4 = vld [vmem:[%s1790_s6] ss:$0 sm:$0xff] }
 0xc78   :  { %v917_v36 = vadd.f32 %v916_v31, %v1621_v55 }
 0xc79   :  { %v919_v32 = vadd.f32 %v915_v30, %v169_v29 }
 0xc7b   :  { %v1225_v33 = vmul.f32 -1.442695, %v919_v32 }
 0xc7d   :  { %1444 = vpow2.f32 %v1225_v33 }
 0xc87   :  { %v1445_v34 = vpop.eup %1444 }
 0xc88   :  { %v923_v35 = vadd.f32 1.0, %v1445_v34 }
 0xc8a   :  { %1446 = vrcp.f32 %v923_v35 }
 0xc94   :  { %v1447_v37 = vpop.eup %1446 }
 0xc95   :  { %v926_v39 = vmul.f32 %v1447_v37, %v917_v36  ;;  %v931_v10 = vsub.f32 1.0, %v1447_v37  ;;  %v937_v14 = vmul.f32 %v1447_v37, %v832_v6 }
 0xc97   :  { %v929_v42 = vadd.f32 %v927_v41, %v926_v39 }
 0xc99   :  { %1448 = vtanh.f32 %v929_v42 }
 0xca3   :  { %v1449_v44 = vpop.eup %1448 }
 0xca4   :  { %933 = vrot.lane.b32.xlu0 %v1449_v44, %s1458_s16 }
 0xd16   :  { %v934_v12 = vpop.permute.xlu0 %933 }
 0xd17   :  { %v936_v47 = vmul.f32 %v934_v12, %v931_v10 }
 0xd19   :  { %v938_v48 = vadd.f32 %v937_v14, %v936_v47 }
 0xd1b   :  { %v946_v49 = vrot.slane %v938_v48, %v1615_v45 }
 0xd1d   :  { %947 = vrot.lane.b32.xlu1 %v946_v49, %s1458_s16 }
 0xd8f   :  { %v948_v50 = vpop.permute.xlu1 %947 }
 0xd90   :  { %951 = vst.msk [vmem:[#allocation2 + $0xc] sm:$0x3] %vm314_vm2, %v948_v50  ;;  %1226 = vmatmul.mubr.msk.f32.vlgmr.msra.gmra.mrb[10].mxu0 %vm208_vm3, %v948_v50 }
 0xd97   :  { %v1064_v20 = vld [vmem:[#allocation2 + $0xc] sm:$0x3] }
 0xe63   :  { %v1020_v51 = vpop.f32.mrb[10].mxu0 }
 0xe64   :  { %v1021_v53 = vadd.f32 %v1020_v51, %v1617_v46  ;;  %v1022_v13 = vpop.f32.mrb[11].mxu0  ;;  %v1067_v46 = vld [vmem:[%s1789_s5 + $0x8] sm:$0xff] }
 0xe65   :  { %v1023_v59 = vadd.f32 %v1022_v13, %v1621_v55  ;;  %v1388_v8 = vpack.c.bf16 %v1067_v46, %v1066_v43  ;;  %v1068_v55 = vld [vmem:[%s1789_s5 + $0x10] sm:$0xff] }
 0xe66   :  { %v1025_v54 = vadd.f32 %v1021_v53, %v171_v52  ;;  %v1392_v9 = vpack.c.bf16 %v1069_v3, %v1068_v55 }
 0xe67   :  { %1389 = vmatprep.subr.bf16.mxu1 %v1388_v8 }
 0xe68   :  { %v1227_v56 = vmul.f32 -1.442695, %v1025_v54  ;;  %1391 = vmatpush3.bf16.msra.mxu1 %v1388_v8 }
 0xe69   :  { %1393 = vmatprep.subr.bf16.mxu1 %v1392_v9 }
 0xe6a   :  { %1450 = vpow2.f32 %v1227_v56 }
 0xe6c   :  { %1395 = vmatpush3.bf16.msra.mxu1 %v1392_v9 }
 0xe6d   :  { %1397 = vmatprep.subr.bf16.mxu1 %v1396_v63 }
 0xe70   :  { %1399 = vmatpush3.bf16.msra.mxu1 %v1396_v63 }
 0xe71   :  { %1401 = vmatprep.subr.bf16.mxu1 %v1400_v24 }
 0xe74   :  { %v1451_v57 = vpop.eup %1450  ;;  %1403 = vmatpush3.bf16.msra.mxu1 %v1400_v24 }
 0xe75   :  { %v1029_v58 = vadd.f32 1.0, %v1451_v57 }
 0xe77   :  { %1452 = vrcp.f32 %v1029_v58 }
 0xe81   :  { %v1453_v60 = vpop.eup %1452 }
 0xe82   :  { %v1032_v61 = vmul.f32 %v1453_v60, %v1023_v59  ;;  %v1037_v27 = vsub.f32 1.0, %v1453_v60  ;;  %v1043_v2 = vmul.f32 %v1453_v60, %v938_v48 }
 0xe84   :  { %v1035_v40 = vadd.f32 %v1033_v38, %v1032_v61 }
 0xe86   :  { %1454 = vtanh.f32 %v1035_v40 }
 0xe90   :  { %v1455_v62 = vpop.eup %1454 }
 0xe91   :  { %1039 = vrot.lane.b32.xlu0 %v1455_v62, %s1458_s16 }
 0xf03   :  { %v1040_v1 = vpop.permute.xlu0 %1039 }
 0xf04   :  { %v1042_v5 = vmul.f32 %v1040_v1, %v1037_v27 }
 0xf06   :  { %v1044_v6 = vadd.f32 %v1043_v2, %v1042_v5 }
 0xf08   :  { %v1052_v7 = vrot.slane %v1044_v6, %v1615_v45 }
 0xf0a   :  { %1053 = vrot.lane.b32.xlu1 %v1052_v7, %s1458_s16 }
 0xf7c   :  { %v1054_v11 = vpop.permute.xlu1 %1053 }
 0xf7d   :  { %1057 = vst.msk [vmem:[#allocation2 + $0xe] sm:$0x3] %vm314_vm2, %v1054_v11 }
 0xf84   :  { %v1065_v21 = vld [vmem:[#allocation2 + $0xe] sm:$0x3] }
 0xf85   :  { %v1107_v22 = vcombine.low %v1064_v20, %v1065_v21 }
 0xf87   :  { %v1121_v26 = vrot.slane %v1107_v22, %v1615_v45 }
 0xf89   :  { %v1122_v28 = vcombine.low %v1114_v25, %v1121_v26 }
 0xf8b   :  { %1258 = vmatmul.mubr.msk.f32.vlgmr.msra.gmra.mrb[8].mxu1 %vm208_vm3, %v1122_v28 }
0x105e   :  { %v1259_v29 = vpop.f32.mrb[8].mxu1 }
0x105f   :  { %v1199_v30 = vadd.f32 %v1259_v29, %v1228_v4  ;;  %v1193_v31 = vpop.f32.mrb[9].mxu1 }
0x1060   :  { %v1194_v32 = vadd.f32 %v1228_v4, %v1193_v31 }
0x1061   :  { %1204 = vst.msk [vmem:[%s1791_s7 + $0x8] sm:$0xff] %vm1202_vm4, %v1199_v30 }
0x1062   :  { %1203 = vst.msk [vmem:[%s1791_s7] sm:$0xff] %vm1202_vm4, %v1194_v32 }

</bundles_post_ra>
